<compile_context>
chip_gen: v5e
topology: v5e:2x2
jax: 0.10.0
libtpu: 0.0.40
codegen_flags: <defaults>
</compile_context>

<pallas_src>
import functools

import jax
import jax.numpy as jnp
from jax import lax
from jax.experimental import pallas as pl
from jax.experimental.pallas import tpu as pltpu


def _self_attn_kernel(*refs, tile_n, row_chunk, fuse_qk, mxu_dtype):
    if fuse_qk:
        gamma_ref, wqk_ref, wv_ref, xm_ref, xr_ref, o_ref = refs
    else:
        gamma_ref, wq_ref, wk_ref, wv_ref, xm_ref, xr_ref, o_ref = refs

    j = pl.program_id(1)
    col = pl.multiple_of(j * tile_n, tile_n)   # tile_n is a multiple of 128 (or == N)
    gamma = gamma_ref[0]

    @pl.when(gamma == 0.0)
    def _():
        # Module initializes gamma = 0: attention contributes nothing -> copy.
        o_ref[0] = xr_ref[0].astype(o_ref.dtype)

    @pl.when(gamma != 0.0)
    def _():
        C = xm_ref.shape[1]
        N = xm_ref.shape[2]
        x_tile = xm_ref[0, :, pl.ds(col, tile_n)]          # (C, Tn), mxu_dtype

        # Column operand of the logit matmul:
        #   fused:   q = (Wq^T Wk) @ x_tile  (C,  Tn)  -> S contraction depth C
        #   unfused: g =  Wk       @ x_tile  (C8, Tn)  -> S contraction depth C/8
        if fuse_qk:
            colop = jnp.dot(wqk_ref[...], x_tile,
                            preferred_element_type=jnp.float32).astype(mxu_dtype)
        else:
            colop = jnp.dot(wk_ref[...], x_tile,
                            preferred_element_type=jnp.float32).astype(mxu_dtype)

        def row_operands(r, size):
            x_rows = xm_ref[0, :, pl.ds(r, size)]          # (C, size), mxu_dtype
            if fuse_qk:
                rowop = x_rows
            else:
                # f = Wq @ x_rows : (C8, size).  Per-chunk recompute; cheap next
                # to the depth-C fused logits it replaces for large C.
                rowop = jnp.dot(wq_ref[...], x_rows,
                                preferred_element_type=jnp.float32).astype(mxu_dtype)
            return x_rows, rowop

        def logits(rowop):
            # S[m, n] = sum_c rowop[c, m] * colop[c, n]: contract axis 0 of both
            # operands directly -- no XLU transpose materialization.
            return lax.dot_general(rowop, colop,
                                   dimension_numbers=(((0,), (0,)), ((), ())),
                                   preferred_element_type=jnp.float32)

        num_chunks = N // row_chunk
        if num_chunks == 1:
            # Whole softmax axis in one pass (small N / VMEM fits (N, Tn)).
            x_rows, rowop = row_operands(0, N)
            s = logits(rowop)                               # (N, Tn) f32
            p = jnp.exp(s - jnp.max(s, axis=0, keepdims=True))
            l = jnp.sum(p, axis=0, keepdims=True)           # (1, Tn) f32
            acc = jnp.dot(x_rows, p.astype(mxu_dtype),       # (C, Tn) f32
                          preferred_element_type=jnp.float32)
        else:
            # Streaming (flash-style) softmax over row chunks: S never
            # materializes at (N, Tn); peak temporary is (row_chunk, Tn).
            def body(i, carry):
                m_run, l_run, acc_run = carry
                r = pl.multiple_of(i * row_chunk, row_chunk)
                x_rows, rowop = row_operands(r, row_chunk)
                s = logits(rowop)                            # (R, Tn) f32
                m_new = jnp.maximum(m_run, jnp.max(s, axis=0, keepdims=True))
                alpha = jnp.exp(m_run - m_new)
                p = jnp.exp(s - m_new)
                l_new = alpha * l_run + jnp.sum(p, axis=0, keepdims=True)
                acc_new = alpha * acc_run + jnp.dot(
                    x_rows, p.astype(mxu_dtype),
                    preferred_element_type=jnp.float32)
                return m_new, l_new, acc_new

            m0 = jnp.full((1, tile_n), -jnp.inf, dtype=jnp.float32)
            l0 = jnp.zeros((1, tile_n), dtype=jnp.float32)
            a0 = jnp.zeros((C, tile_n), dtype=jnp.float32)
            _, l, acc = lax.fori_loop(0, num_chunks, body, (m0, l0, a0))

        # Deferred softmax normalization: scale the (C, Tn) accumulator once
        # instead of normalizing (N, Tn) probabilities.
        xb = acc * pl.reciprocal(l, approx=True)             # (C, Tn) f32

        # h @ beta == Wv @ (x @ beta): only x stays resident, not h.
        attn = jnp.dot(wv_ref[...], xb.astype(mxu_dtype),
                       preferred_element_type=jnp.float32)    # (C, Tn) f32

        o_ref[0] = (gamma * attn + xr_ref[0].astype(jnp.float32)).astype(o_ref.dtype)


def _pick_tile(n, target):
    """Largest multiple of 128 <= target that divides n (falls back to n)."""
    if n % 128 != 0:
        return n
    t = max(128, (min(target, n) // 128) * 128)
    while n % t != 0:
        t -= 128
    return t


def _vmem_capacity_bytes():
    try:
        return int(pltpu.get_tpu_info().vmem_capacity_bytes)
    except Exception:
        return 64 * 1024 * 1024            # conservative (v7x per-TensorCore)


def _estimate_vmem(C, N, tn, rows, c_row, mxu_b, x_b, out_b):
    est = 2 * C * N * mxu_b                # resident x_mxu (double-buffered)
    est += 2 * C * tn * x_b                # residual column tile
    est += 2 * C * tn * out_b              # output column tile
    est += 2 * 2 * C * C * mxu_b           # weight blocks (conservative bound)
    est += 3 * rows * tn * 4               # s / p / reduction temporaries
    est += 3 * C * tn * 4                  # acc / xb / attn
    est += 2 * c_row * tn * 4              # column operand of the logit matmul
    return est


def self_attention_pallas(x_nchw, wq, wk, wv, gamma, *,
                          tile_n=None, row_chunk=None,
                          mxu_dtype=jnp.bfloat16, fuse_qk=None):
    """x_nchw: (B, C, H, W); wq/wk: (C//8, C); wv: (C, C); gamma: (1,) f32.

    tile_n:    target attention column tile (snapped to a 128-multiple divisor
               of N).  Auto-chosen per chip when None.
    row_chunk: softmax row chunk for the streaming path (None = auto; N = no
               streaming).  Must be a 128-multiple divisor of N to take effect.
    mxu_dtype: matmul operand dtype (bf16 fast path; softmax/accumulate/residual
               stay f32).  Use jnp.float32 as the high-accuracy escape hatch.
    fuse_qk:   None = auto (fuse Wq^T Wk only when C <= 128, i.e. one MXU pass).
    """
    B, C, H, W = x_nchw.shape
    N = H * W
    x = x_nchw.reshape(B, C, N)
    C8 = wq.shape[0]

    if fuse_qk is None:
        fuse_qk = C <= 128

    mxu_b = jnp.dtype(mxu_dtype).itemsize
    x_b = jnp.dtype(x.dtype).itemsize
    phys_vmem = _vmem_capacity_bytes()
    # Per-generation clamp: headroom on 64 MiB chips (v7x); use most of the
    # 128 MiB on v5e/v6e.
    cap = 56 * 1024 * 1024 if phys_vmem <= 64 * 1024 * 1024 else 104 * 1024 * 1024
    budget = int(cap * 0.8)

    target = 2048 if phys_vmem > 64 * 1024 * 1024 else 1024
    tn = _pick_tile(N, target if tile_n is None else tile_n)
    c_row = C if fuse_qk else C8

    def est(t, rows):
        return _estimate_vmem(C, N, t, rows, c_row, mxu_b, x_b, x_b)

    if row_chunk is not None:
        rc = row_chunk if (0 < row_chunk < N and N % row_chunk == 0
                           and row_chunk % 128 == 0) else N
    else:
        rc = N
        if N % 128 == 0 and est(tn, N) > budget:
            # Prefer streaming the softmax rows over shrinking the lane-dense
            # output tile; shrink tn only as a last resort.
            for cand in (2048, 1024, 512, 256, 128):
                if N % cand == 0:
                    rc = cand
                    if est(tn, cand) <= budget:
                        break
            while tn > 128 and est(tn, rc) > budget:
                tn = _pick_tile(N, tn - 128)

    vmem_limit = int(min(cap, max(32 * 1024 * 1024, int(1.2 * est(tn, rc)))))

    # Pre-cast operands once in the wrapper (halves weight/x DMA bytes for the
    # bf16 path and removes per-grid-step VPU casts inside the kernel).
    gamma = gamma.astype(jnp.float32)
    x_mxu = x.astype(mxu_dtype)
    wv_m = wv.astype(mxu_dtype)
    if fuse_qk:
        # Algebraic fusion: S = (Wq x)^T (Wk x) = x^T (Wq^T Wk) x.
        wqk = jnp.dot(wq.astype(jnp.float32).T, wk.astype(jnp.float32),
                      preferred_element_type=jnp.float32,
                      precision=jax.lax.Precision.HIGHEST).astype(mxu_dtype)
        weight_args = (wqk, wv_m)
        weight_specs = [
            pl.BlockSpec((C, C), lambda b, j: (0, 0)),       # Wqk
            pl.BlockSpec((C, C), lambda b, j: (0, 0)),       # Wv
        ]
    else:
        weight_args = (wq.astype(mxu_dtype), wk.astype(mxu_dtype), wv_m)
        weight_specs = [
            pl.BlockSpec((C8, C), lambda b, j: (0, 0)),      # Wq
            pl.BlockSpec((C8, C), lambda b, j: (0, 0)),      # Wk
            pl.BlockSpec((C, C), lambda b, j: (0, 0)),       # Wv
        ]

    grid = (B, N // tn)
    kernel = functools.partial(_self_attn_kernel, tile_n=tn, row_chunk=rc,
                               fuse_qk=fuse_qk, mxu_dtype=mxu_dtype)

    out = pl.pallas_call(
        kernel,
        out_shape=jax.ShapeDtypeStruct((B, C, N), x.dtype),
        grid_spec=pltpu.PrefetchScalarGridSpec(
            num_scalar_prefetch=0,
            grid=grid,
            in_specs=(
                [pl.BlockSpec(memory_space=pltpu.MemorySpace.SMEM)]   # gamma (1,)
                + weight_specs
                + [
                    # Full-row x in mxu_dtype; index constant over j -> resident
                    # per batch.
                    pl.BlockSpec((1, C, N), lambda b, j: (b, 0, 0)),
                    # Original-dtype column tile, used only for the residual add.
                    pl.BlockSpec((1, C, tn), lambda b, j: (b, 0, j)),
                ]
            ),
            # Lane-dense, 128-aligned column tile of the output.
            out_specs=pl.BlockSpec((1, C, tn), lambda b, j: (b, 0, j)),
        ),
        compiler_params=pltpu.CompilerParams(
            dimension_semantics=("parallel", "parallel"),
            vmem_limit_bytes=vmem_limit,
        ),
    )(gamma, *weight_args, x_mxu, x)

    return out.reshape(B, C, H, W)


def self_attention_ref(x_nchw, wq, wk, wv, gamma):
    """Pure-JAX f32 reference mirroring the PyTorch forward exactly."""
    hi = jax.lax.Precision.HIGHEST
    B, C, H, W = x_nchw.shape
    x = x_nchw.reshape(B, C, H * W).astype(jnp.float32)
    f = jnp.einsum("oc,bcn->bon", wq, x, precision=hi)
    g = jnp.einsum("oc,bcn->bon", wk, x, precision=hi)
    h = jnp.einsum("oc,bcn->bon", wv, x, precision=hi)
    s = jnp.einsum("bcm,bcn->bmn", f, g, precision=hi)    # f^T @ g : (B, N, N)
    beta = jax.nn.softmax(s, axis=1)                      # torch softmax(dim=1)
    o = gamma[0] * jnp.einsum("bcn,bnm->bcm", h, beta, precision=hi) + x
    return o.reshape(B, C, H, W)


if __name__ == "__main__":
    key = jax.random.PRNGKey(0)
    k_x, k_q, k_k, k_v, k_x2, k_q2, k_k2, k_v2 = jax.random.split(key, 8)

    # ---- Case A: small C (fused Wqk path), B=2, C=32, 16x16 -> N=256 ----
    B, C, H, W = 2, 32, 16, 16          # n_channels must be >= 8 (C//8 q/k dim)
    C8 = C // 8
    x = jax.random.normal(k_x, (B, C, H, W), dtype=jnp.float32)
    std = (2.0 / C) ** 0.5              # kaiming_normal_ for 1x1 conv weights
    wq = jax.random.normal(k_q, (C8, C), dtype=jnp.float32) * std
    wk = jax.random.normal(k_k, (C8, C), dtype=jnp.float32) * std
    wv = jax.random.normal(k_v, (C, C), dtype=jnp.float32) * std

    gamma_t = jnp.array([0.7], dtype=jnp.float32)
    ref = self_attention_ref(x, wq, wk, wv, gamma_t)

    # 1) f32 MXU path with column tiling exercised (tile_n=128 -> 2 tiles/batch).
    out = jax.block_until_ready(self_attention_pallas(
        x, wq, wk, wv, gamma_t, tile_n=128, mxu_dtype=jnp.float32))
    err = float(jnp.max(jnp.abs(out - ref)))
    assert jnp.allclose(out, ref, atol=2e-2, rtol=2e-2), ("f32", err)

    # 2) f32 + streamed (flash-style) softmax: row_chunk=128 -> 2 row chunks.
    out = jax.block_until_ready(self_attention_pallas(
        x, wq, wk, wv, gamma_t, tile_n=128, row_chunk=128,
        mxu_dtype=jnp.float32))
    err = float(jnp.max(jnp.abs(out - ref)))
    assert jnp.allclose(out, ref, atol=2e-2, rtol=2e-2), ("f32-stream", err)

    # 3) Default bf16-MXU fast path (f32 softmax/accumulate/residual).
    out = jax.block_until_ready(self_attention_pallas(
        x, wq, wk, wv, gamma_t, tile_n=128))
    err = float(jnp.max(jnp.abs(out - ref)))
    assert jnp.allclose(out, ref, atol=2.5e-1, rtol=1e-1), ("bf16", err)

    # 4) Module-faithful init (gamma = 0): identity fast path, exact copy.
    gamma0 = jnp.array([0.0], dtype=jnp.float32)
    out0 = jax.block_until_ready(self_attention_pallas(x, wq, wk, wv, gamma0))
    assert jnp.array_equal(out0, x), "gamma==0 path must be an exact copy"

    # ---- Case B: larger C (unfused f/g path, S contraction depth C/8) ----
    B2, C2, H2, W2 = 1, 256, 16, 16
    C2_8 = C2 // 8
    x2 = jax.random.normal(k_x2, (B2, C2, H2, W2), dtype=jnp.float32)
    std2 = (2.0 / C2) ** 0.5
    # q/k weights scaled down so the softmax is well-conditioned and the f32
    # comparison against the reference stays meaningful.
    wq2 = jax.random.normal(k_q2, (C2_8, C2), dtype=jnp.float32) * std2 * 0.25
    wk2 = jax.random.normal(k_k2, (C2_8, C2), dtype=jnp.float32) * std2 * 0.25
    wv2 = jax.random.normal(k_v2, (C2, C2), dtype=jnp.float32) * std2
    ref2 = self_attention_ref(x2, wq2, wk2, wv2, gamma_t)
    out2 = jax.block_until_ready(self_attention_pallas(
        x2, wq2, wk2, wv2, gamma_t, tile_n=128, mxu_dtype=jnp.float32))
    err2 = float(jnp.max(jnp.abs(out2 - ref2)))
    assert jnp.allclose(out2, ref2, atol=5e-2, rtol=5e-2), ("unfused", err2)

    print("KERNEL_OK")
</pallas_src>

<mosaic_0001>
module attributes {stable_mosaic.version = 11 : i64} {
  func.func @_self_attn_kernel(%arg0: i32, %arg1: i32, %arg2: memref<1xf32, #tpu.memory_space<smem>>, %arg3: memref<32x32xf32, #tpu.memory_space<vmem>>, %arg4: memref<32x32xf32, #tpu.memory_space<vmem>>, %arg5: memref<1x32x256xf32, #tpu.memory_space<vmem>>, %arg6: memref<1x32x128xf32, #tpu.memory_space<vmem>>, %arg7: memref<1x32x128xf32, #tpu.memory_space<vmem>>) attributes {dimension_semantics = [#tpu.dimension_semantics<parallel>, #tpu.dimension_semantics<parallel>], iteration_bounds = array<i64: 2, 2>, scalar_prefetch = 0 : i64, scratch_operands = 0 : i64, tpu.core_type = #tpu.core_type<tc>, window_params = [{transform_indices = @transform_0, window_bounds = array<i64: 1>}, {pipeline_mode = #tpu.pipeline_mode<synchronous>, transform_indices = @transform_1, window_bounds = array<i64: 32, 32>}, {pipeline_mode = #tpu.pipeline_mode<synchronous>, transform_indices = @transform_2, window_bounds = array<i64: 32, 32>}, {transform_indices = @transform_3, window_bounds = array<i64: 1, 32, 256>}, {transform_indices = @transform_4, window_bounds = array<i64: 1, 32, 128>}, {transform_indices = @transform_5, window_bounds = array<i64: 1, 32, 128>}]} {
    %c128_i32 = arith.constant 128 : i32
    %0 = arith.muli %arg1, %c128_i32 : i32
    %1 = tpu.assume_multiple %0, 128 : i32
    %c0 = arith.constant 0 : index
    %2 = memref.load %arg2[%c0] : memref<1xf32, #tpu.memory_space<smem>>
    %cst = arith.constant 0.000000e+00 : f32
    %3 = arith.cmpf oeq, %2, %cst : f32
    %4 = arith.extui %3 : i1 to i32
    %c0_i32 = arith.constant 0 : i32
    %5 = arith.cmpi ne, %4, %c0_i32 : i32
    scf.if %5 {
      %c0_2 = arith.constant 0 : index
      %c0_3 = arith.constant 0 : index
      %c0_4 = arith.constant 0 : index
      %9 = vector.load %arg6[%c0_2, %c0_3, %c0_4] : memref<1x32x128xf32, #tpu.memory_space<vmem>>, vector<1x32x128xf32>
      %10 = vector.shape_cast %9 : vector<1x32x128xf32> to vector<32x128xf32>
      %c0_5 = arith.constant 0 : index
      %c0_6 = arith.constant 0 : index
      %c0_7 = arith.constant 0 : index
      %11 = vector.load %arg7[%c0_5, %c0_6, %c0_7] : memref<1x32x128xf32, #tpu.memory_space<vmem>>, vector<1x32x128xf32>
      %12 = vector.shape_cast %11 : vector<1x32x128xf32> to vector<32x128xf32>
      %13 = vector.shape_cast %10 : vector<32x128xf32> to vector<1x32x128xf32>
      tpu.vector_store %arg7[%c0_5, %c0_6, %c0_7], %13 {strides = array<i32>} : memref<1x32x128xf32, #tpu.memory_space<vmem>>, vector<1x32x128xf32>,
    } else {
    }
    %cst_0 = arith.constant 0.000000e+00 : f32
    %6 = arith.cmpf one, %2, %cst_0 : f32
    %7 = arith.extui %6 : i1 to i32
    %c0_i32_1 = arith.constant 0 : i32
    %8 = arith.cmpi ne, %7, %c0_i32_1 : i32
    scf.if %8 {
      %c0_2 = arith.constant 0 : index
      %c0_3 = arith.constant 0 : index
      %9 = arith.index_cast %1 : i32 to index
      %10 = vector.load %arg5[%c0_2, %c0_3, %9] : memref<1x32x256xf32, #tpu.memory_space<vmem>>, vector<1x32x128xf32>
      %11 = vector.shape_cast %10 : vector<1x32x128xf32> to vector<32x128xf32>
      %c0_4 = arith.constant 0 : index
      %c0_5 = arith.constant 0 : index
      %12 = vector.load %arg3[%c0_4, %c0_5] : memref<32x32xf32, #tpu.memory_space<vmem>>, vector<32x32xf32>
      %cst_6 = arith.constant dense<0.000000e+00> : vector<32x128xf32>
      %13 = tpu.matmul %12, %11, %cst_6 {dimension_numbers = #tpu.dot_dimension_numbers<[1], [0], [0], [1], [0, 0, 1, 1], [], []>} : vector<32x32xf32>, vector<32x128xf32>, vector<32x128xf32> -> vector<32x128xf32>
      %c0_7 = arith.constant 0 : index
      %c0_8 = arith.constant 0 : index
      %c0_9 = arith.constant 0 : index
      %14 = vector.load %arg5[%c0_7, %c0_8, %c0_9] : memref<1x32x256xf32, #tpu.memory_space<vmem>>, vector<1x32x256xf32>
      %15 = vector.shape_cast %14 : vector<1x32x256xf32> to vector<32x256xf32>
      %cst_10 = arith.constant dense<0.000000e+00> : vector<256x128xf32>
      %16 = tpu.matmul %15, %13, %cst_10 {dimension_numbers = #tpu.dot_dimension_numbers<[0], [0], [1], [1], [0, 1, 1, 1], [], []>} : vector<32x256xf32>, vector<32x128xf32>, vector<256x128xf32> -> vector<256x128xf32>
      %cst_11 = arith.constant dense<0xFF800000> : vector<128xf32>
      %17 = vector.multi_reduction <maximumf>, %16, %cst_11 [0] : vector<256x128xf32> to vector<128xf32>
      %18 = vector.shape_cast %17 : vector<128xf32> to vector<1x128xf32>
      %19 = vector.broadcast %18 : vector<1x128xf32> to vector<256x128xf32>
      %20 = arith.subf %16, %19 : vector<256x128xf32>
      %21 = math.exp %20 : vector<256x128xf32>
      %cst_12 = arith.constant dense<0.000000e+00> : vector<128xf32>
      %22 = vector.multi_reduction <add>, %21, %cst_12 [0] : vector<256x128xf32> to vector<128xf32>
      %23 = vector.shape_cast %22 : vector<128xf32> to vector<1x128xf32>
      %cst_13 = arith.constant dense<0.000000e+00> : vector<32x128xf32>
      %24 = tpu.matmul %15, %21, %cst_13 {dimension_numbers = #tpu.dot_dimension_numbers<[1], [0], [0], [1], [0, 0, 1, 1], [], []>} : vector<32x256xf32>, vector<256x128xf32>, vector<32x128xf32> -> vector<32x128xf32>
      %25 = tpu.reciprocal %23 {approx = true} : vector<1x128xf32> -> vector<1x128xf32>
      %26 = vector.broadcast %25 : vector<1x128xf32> to vector<32x128xf32>
      %27 = arith.mulf %24, %26 : vector<32x128xf32>
      %c0_14 = arith.constant 0 : index
      %c0_15 = arith.constant 0 : index
      %28 = vector.load %arg4[%c0_14, %c0_15] : memref<32x32xf32, #tpu.memory_space<vmem>>, vector<32x32xf32>
      %cst_16 = arith.constant dense<0.000000e+00> : vector<32x128xf32>
      %29 = tpu.matmul %28, %27, %cst_16 {dimension_numbers = #tpu.dot_dimension_numbers<[1], [0], [0], [1], [0, 0, 1, 1], [], []>} : vector<32x32xf32>, vector<32x128xf32>, vector<32x128xf32> -> vector<32x128xf32>
      %30 = vector.broadcast %2 : f32 to vector<32x128xf32>
      %31 = arith.mulf %30, %29 : vector<32x128xf32>
      %c0_17 = arith.constant 0 : index
      %c0_18 = arith.constant 0 : index
      %c0_19 = arith.constant 0 : index
      %32 = vector.load %arg6[%c0_17, %c0_18, %c0_19] : memref<1x32x128xf32, #tpu.memory_space<vmem>>, vector<1x32x128xf32>
      %33 = vector.shape_cast %32 : vector<1x32x128xf32> to vector<32x128xf32>
      %34 = arith.addf %31, %33 : vector<32x128xf32>
      %c0_20 = arith.constant 0 : index
      %c0_21 = arith.constant 0 : index
      %c0_22 = arith.constant 0 : index
      %35 = vector.load %arg7[%c0_20, %c0_21, %c0_22] : memref<1x32x128xf32, #tpu.memory_space<vmem>>, vector<1x32x128xf32>
      %36 = vector.shape_cast %35 : vector<1x32x128xf32> to vector<32x128xf32>
      %37 = vector.shape_cast %34 : vector<32x128xf32> to vector<1x32x128xf32>
      tpu.vector_store %arg7[%c0_20, %c0_21, %c0_22], %37 {strides = array<i32>} : memref<1x32x128xf32, #tpu.memory_space<vmem>>, vector<1x32x128xf32>,
    } else {
    }
    return
  }
  func.func @transform_0(%arg0: i32, %arg1: i32) -> i32 {
    %c0_i32 = arith.constant 0 : i32
    %c0_i32_0 = arith.constant 0 : i32
    return %c0_i32 : i32
  }
  func.func @transform_1(%arg0: i32, %arg1: i32) -> (i32, i32) {
    %c0_i32 = arith.constant 0 : i32
    %c0_i32_0 = arith.constant 0 : i32
    %c0_i32_1 = arith.constant 0 : i32
    return %c0_i32, %c0_i32_0 : i32, i32
  }
  func.func @transform_2(%arg0: i32, %arg1: i32) -> (i32, i32) {
    %c0_i32 = arith.constant 0 : i32
    %c0_i32_0 = arith.constant 0 : i32
    %c0_i32_1 = arith.constant 0 : i32
    return %c0_i32, %c0_i32_0 : i32, i32
  }
  func.func @transform_3(%arg0: i32, %arg1: i32) -> (i32, i32, i32) {
    %c0_i32 = arith.constant 0 : i32
    %c0_i32_0 = arith.constant 0 : i32
    %c0_i32_1 = arith.constant 0 : i32
    return %arg0, %c0_i32, %c0_i32_0 : i32, i32, i32
  }
  func.func @transform_4(%arg0: i32, %arg1: i32) -> (i32, i32, i32) {
    %c0_i32 = arith.constant 0 : i32
    %c0_i32_0 = arith.constant 0 : i32
    return %arg0, %c0_i32, %arg1 : i32, i32, i32
  }
  func.func @transform_5(%arg0: i32, %arg1: i32) -> (i32, i32, i32) {
    %c0_i32 = arith.constant 0 : i32
    %c0_i32_0 = arith.constant 0 : i32
    return %arg0, %c0_i32, %arg1 : i32, i32, i32
  }
}

</mosaic_0001>

<bundles_post_ra>
// kernel: tpu_custom_call.1
= control target key start
LH: loop header
LB: loop body
LE: loop exit
PB: predicated region body
PF: predicated region fallthrough
CT: control target
= control target key end

     0   :  { %s2256_s0 = inlined_call_operand.<no memory space> [shape: f32[1], index: 0, kind: input, shape index: {}]   ;;  %s2257_s1 = inlined_call_operand.hbm [shape: f32[32,32], index: 1, kind: input, shape index: {}]   ;;  %s2258_s2 = inlined_call_operand.hbm [shape: f32[32,32], index: 2, kind: input, shape index: {}]   ;;  %s2259_s3 = inlined_call_operand.hbm [shape: f32[2,32,256], index: 3, kind: input, shape index: {}]   ;;  %s2260_s4 = inlined_call_operand.hbm [shape: f32[2,32,256], index: 4, kind: input, shape index: {}]   ;;  %s2261_s5 = inlined_call_operand.hbm [shape: f32[2,32,256], index: 5, kind: output, shape index: {}]  }
   0x1   :  { %2273 = sst [smem:[#allocation23_spill]] %s2257_s1 }
   0x2   :  { %2274 = sst [smem:[#allocation24_spill]] %s2258_s2 }
   0x3   :  { %2275 = sst [smem:[#allocation25_spill]] %s2259_s3 }
   0x4   :  { %2276 = sst [smem:[#allocation26_spill]] %s2261_s5 }
   0x5   :  { %10 = sst [smem:[#allocation2]] %s2256_s0 }
   0x6   :  { %11 = vsyncpa [#allocation4], 0 }
   0x7   :  { %12 = vsyncpa [#allocation7], 0 }
   0x8   :  { %13 = vsyncpa [#allocation5], 0 }
   0x9   :  { %15 = vsyncpa [#allocation5 + $0x1], 0  ;;  %s1705_s20 = smov 0   ;;  %s1707_s21 = smov 0  }
   0xa   :  { %s1709_s22 = smov 0   ;;  %s1711_s23 = smov 0  }
   0xb   :  { %s1713_s24 = smov 0   ;;  %s1715_s25 = smov 0  }
   0xc   :  { %s1717_s26 = smov 0   ;;  %s1719_s27 = smov 0  }
   0xd   :  { %s1721_s0 = smov 0   ;;  %s1723_s28 = smov 0  }
   0xe   :  { %s1725_s29 = smov 0  }
   0xf LB: > { %2277 = sst [smem:[#allocation16_spill]] %s1621_s20  ;;  %s1759_s30 = sadd.s32 4294967295, %s1661_s29   ;;  %s1661_s29 = sphi %s1725_s29, %s21_s29   ;;  %s1657_s28 = sphi %s1723_s28, %s2317_s28   ;;  %s1653_s0 = sphi %s1721_s0, %s2316_s0   ;;  %s1649_s27 = sphi %s1719_s27, %s2315_s27   ;;  %s1645_s26 = sphi %s1717_s26, %s2314_s26   ;;  %s1641_s25 = sphi %s1715_s25, %s2313_s25   ;;  %s1637_s24 = sphi %s1713_s24, %s2312_s24   ;;  %s1633_s23 = sphi %s1711_s23, %s2311_s23   ;;  %s1629_s22 = sphi %s1709_s22, %s2310_s22   ;;  %s1625_s21 = sphi %s1707_s21, %s2309_s21   ;;  %s1621_s20 = sphi %s1705_s20, %s2308_s20  }
  0x10   : > { %2278 = sst [smem:[#allocation17_spill]] %s1645_s26  ;;  %s1128_s6 = sadd.s32 4294967294, %s1661_s29  }
  0x11   : > { %2279 = sst [smem:[#allocation18_spill]] %s1649_s27  ;;  %p116_p0 = scmp.ne.s32.totalorder %s1637_s24, %s1633_s23 }
  0x12   : > { %p117_p1 = scmp.eq.s32.totalorder %s1759_s30, 0  ;;  %p144_p2 = scmp.ne.s32.totalorder %s1625_s21, %s1621_s20 }
  0x13   : > { %p170_p3 = scmp.eq.s32.totalorder %s1759_s30, 3  ;;  %p176_p5 = scmp.eq.s32.totalorder %s1128_s6, 3 }
  0x14   : > { %p1769_p4 = por %p117_p1, %p116_p0  ;;  %p1775_p6 = por %p144_p2, %p117_p1 }
  0x15   : > { %p1129_p7 = scmp.ge.s32.totalorder %s1661_s29, 1  ;;  %p1780_p8 = por %p176_p5, %p144_p2 }
  0x16   : > { %s2281_s8 = scalar_select %p1775_p6, 1, 0 }
  0x17   : > { %s2283_s9 = scalar_select %p1780_p8, 1, 0 }
  0x18   : > { %2282 = sst [smem:[#allocation19_spill]] %s2281_s8  ;;  %p183_p9 = scmp.lt.s32.totalorder %s1661_s29, 5 }
  0x19   : > { %2284 = sst [smem:[#allocation20_spill]] %s2283_s9  ;;  %s1663_s14 = smov [#allocation3]  }
  0x1a   : > { %s2285_s1 = sld [smem:[#allocation23_spill]]  ;;  %p1788_p10 = pnand %p1129_p7, %p183_p9 }
  0x1b   : > { %s199_s15 = sshll.u32 %s1663_s14, 4  ;;  %s2266_s17 = smov 128   ;;  %s200_s15 = int_to_ptr.vmem [resolvable:$true] %s199_s15 }
  0x1c   : > { %p1219_p11 = pneg %p1788_p10  ;;  %s2267_s18 = smov 8  }
  0x1d   : > { %p110_p13 = scmp.ne.s32.totalorder %s1641_s25, %s1637_s24  ;;  %p111_p0 = scmp.eq.s32.totalorder %s1661_s29, 0 }
  0x1e   : > { %p1796_p12 = pnand %p1219_p11, %p117_p1  ;;  %p1239_p2 = scmp.lt.s32.totalorder %s1661_s29, 4 }
  0x1f   : > { %s227_s6 = sand.u32 1, %s1661_s29   ;;  %s229_s10 = sand.u32 1, %s1641_s25  }
  0x20   : > { %s197_s12 = sshll.u32 %s2285_s1, 4  ;;  %p112_p5 = por %p111_p0, %p110_p13  ;;  %s198_s12 = int_to_ptr.hbm [resolvable:$true] %s197_s12 }
  0x21   : > { %1222 = dma.hbm_to_vmem [thread:$0]  (!%p1796_p12), %s198_s12, 512, %s200_s15, [#allocation4], %s2266_s17, %s2266_s17, %s2267_s18  }
  0x22   : > { %s1133_s11 = sshll.u32 %s229_s10, 6  ;;  %s1192_s14 = sshll.u32 %s1657_s28, 6 }
  0x23   : > { %s2288_s3 = sld [smem:[#allocation25_spill]]  ;;  %s231_s12 = scalar_lea.vmem [#allocation8], %s1133_s11 }
  0x24   : > { %s239_s15 = sshll.u32 %s231_s12, 4  ;;  %p1227_p7 = pnand %p1239_p2, %p112_p5  ;;  %s240_s15 = int_to_ptr.vmem [resolvable:$true] %s239_s15 }
  0x25   : > { %s2289_s2 = sld [smem:[#allocation24_spill]]  ;;  %s1824_s1 = scalar_lea.sflag [#allocation4], %s227_s6 }
  0x26   : > { %s1667_s9 = smov 16   ;;  %s1668_s11 = smov [#allocation6]  }
  0x27   : > { %s30_s23 = sadd.s32 1, %s1653_s0  ;;  %s131_s6 = sadd.s32 1, %s1629_s22 }
  0x28   : > { %p31_p9 = scmp.ge.s32.totalorder %s30_s23, 2  ;;  %p138_p11 = scmp.ne.s32.totalorder %s1629_s22, %s1625_s21 }
  0x29   : > { %s236_s20 = scalar_lea.hbm %s2288_s3, %s1192_s14  ;;  %s213_s14 = sshll.u32 %s1668_s11, 4  ;;  %s214_s14 = int_to_ptr.vmem [resolvable:$true] %s213_s14 }
  0x2a   : > { %s237_s5 = sshll.u32 %s236_s20, 4  ;;  %s2265_s20 = smov 256   ;;  %s238_s5 = int_to_ptr.hbm [resolvable:$true] %s237_s5 }
  0x2b   : > { %s211_s19 = sshll.u32 %s2289_s2, 4  ;;  %s251_s12 = sand.u32 1, %s1629_s22   ;;  %s212_s19 = int_to_ptr.hbm [resolvable:$true] %s211_s19 }
  0x2c   : > { %1229 = dma.hbm_to_vmem [thread:$0]  (!%p1227_p7), %s238_s5, 1024, %s240_s15, %s1824_s1, %s2265_s20, %s2265_s20, %s1667_s9  }
  0x2d   : > { %1225 = dma.hbm_to_vmem [thread:$0]  (!%p1796_p12), %s212_s19, 512, %s214_s14, [#allocation7], %s2266_s17, %s2266_s17, %s2267_s18  }
  0x2e   : > { %s2319_s23 = smov (%p31_p9, %s30_s23), 0  ;;  %s2291_s10 = sadd.s32 1, %s1657_s28 }
  0x2f   : > { %2290 = sst [smem:[#allocation21_spill]] %s2319_s23  ;;  %s2321_s10 = smov (!%p31_p9, %s2291_s10), %s1657_s28 }
  0x30   : > { %s127_s5 = ssub.s32 %s1653_s0, %s2319_s23  ;;  %p1848_p13 = por %p138_p11, %p111_p0 }
  0x31   : > { %p35_p12 = scmp.ge.s32.totalorder %s2321_s10, 2  ;;  %p1854_p5 = por %p170_p3, %p138_p11 }
  0x32   : > { %s1136_s15 = sshll.u32 %s251_s12, 5  ;;  %s1137_s9 = sshll.u32 %s1657_s28, 3 }
  0x33   : > { %s2293_s19 = scalar_select %p1854_p5, 1, 0 }
  0x34   : > { %s2323_s10 = smov (%p35_p12, %s2321_s10), 0  ;;  %s257_s11 = sadd.s32 %s1653_s0, %s1137_s9 }
  0x35   : > { %2294 = sst [smem:[#allocation22_spill]] %s2293_s19  ;;  %s100_s14 = ssub.s32 %s1657_s28, %s2323_s10 }
  0x36   : > { %s1138_s20 = sshll.u32 %s257_s11, 3  ;;  %p101_p0 = scmp.eq.s32.totalorder %s100_s14, 0 }
  0x37   : > { %s128_s17 = sor.u32 %s127_s5, %s100_s14  ;;  %s259_s3 = scalar_lea.hbm %s2260_s4, %s1138_s20 }
  0x38   : > { %p129_p7 = scmp.eq.s32.totalorder %s128_s17, 0  ;;  %s2295_s23 = sadd.s32 1, %s1641_s25 }
  0x39   : > { %s1870_s19 = scalar_select %p101_p0, %s1641_s25, %s2295_s23  }
  0x3a   : > { %s1873_s12 = scalar_select %p129_p7, %s1629_s22, %s131_s6  }
  0x3b   : > { %s260_s27 = sshll.u32 %s259_s3, 4  ;;  %s253_s26 = scalar_lea.vmem [#allocation9], %s1136_s15  ;;  %s261_s27 = int_to_ptr.hbm [resolvable:$true] %s260_s27 }
  0x3c   : > { %s262_s8 = sshll.u32 %s253_s26, 4  ;;  %p1230_p3 = pnand %p1239_p2, %p1848_p13  ;;  %s263_s8 = int_to_ptr.vmem [resolvable:$true] %s262_s8 }
  0x3d   : > { %s2296_s9 = smov 8   ;;  %s2297_s5 = smov 128  }
  0x3e   : > { %s2298_s17 = smov 256   ;;  %274 = sbr.rel (%p1788_p10) target bundleno = 946 (0x3b2), region = 40 }
  0x3f   : > { %1232 = dma.hbm_to_vmem [thread:$0]  (!%p1230_p3), %s261_s27, 512, %s263_s8, %s1824_s1, %s2298_s17, %s2297_s5, %s2296_s9  }
  0x43   : > { %1600 = dma.done.wait (%p117_p1), [#allocation4], 512  }
  0x44   : > { %1602 = vsyncadd (%p117_p1), [#allocation4], 4294966784 }
  0x45   : > { %1604 = dma.done.wait (%p117_p1), [#allocation7], 512  }
  0x46   : > { %1606 = vsyncadd (%p117_p1), [#allocation7], 4294966784  ;;  %s286_s2 = sand.u32 1, %s1759_s30   ;;  %s288_s3 = sand.u32 1, %s1637_s24  }
  0x47   : > { %s1142_s26 = sshll.u32 %s288_s3, 6  ;;  %s287_s27 = scalar_lea.sflag [#allocation4], %s286_s2 }
  0x48   : > { %s1895_s8 = scalar_lea.vmem [#allocation8], %s1142_s26 }
  0x49   : > { %1608 = dma.done.wait (%p1769_p4), %s287_s27, 1024  }
  0x4a   : > { %1610 = vsyncadd (%p1769_p4), %s287_s27, 4294966272  ;;  %s298_s18 = sand.u32 1, %s1625_s21  }
  0x4b   : > { %s1143_s1 = sshll.u32 %s298_s18, 5 }
  0x4c   : > { %s1904_s20 = scalar_lea.vmem [#allocation9], %s1143_s1 }
  0x4d   : > { %1612 = dma.done.wait (%p1775_p6), %s287_s27, 512  }
  0x4e   : > { %1614 = vsyncadd (%p1775_p6), %s287_s27, 4294966784  ;;  %s2300_s30 = sld [smem:[#allocation17_spill]]  ;;  %s1914_s7 = scalar_lea.vmem [#allocation10], %s1143_s1 }
  0x4f   : > { %s1911_s6 = sld [smem:[#allocation2]] }
  0x54   : > { %s1145_s23 = sshll.u32 %s2300_s30, 7 }
  0x55   : > { %p335_p1 = scmp.eq.f32.partialorder %s1911_s6, 0.0 }
  0x56   : > { %v339_v0 = vld [vmem:[%s1904_s20] sm:$0xff] (%p335_p1)  ;;  %v340_v1 = vld [vmem:[%s1904_s20 + $0x8] sm:$0xff] (%p335_p1)  ;;  %v341_v2 = vld [vmem:[%s1904_s20 + $0x10] sm:$0xff] (%p335_p1) }
  0x57   : > { %338 = sbr.rel (!%p335_p1) target bundleno = 92 (0x5c), region = 60  ;;  %343 = vst [vmem:[%s1914_s7] sm:$0xff] (%p335_p1), %v339_v0  ;;  %v342_v3 = vld [vmem:[%s1904_s20 + $0x18] sm:$0xff] (%p335_p1) }
  0x58   : > { %344 = vst [vmem:[%s1914_s7 + $0x8] sm:$0xff] (%p335_p1), %v340_v1 }
  0x59   : > { %345 = vst [vmem:[%s1914_s7 + $0x10] sm:$0xff] (%p335_p1), %v341_v2 }
  0x5a   : > { %346 = vst [vmem:[%s1914_s7 + $0x18] sm:$0xff] (%p335_p1), %v342_v3 }
  0x5c PF: > { %p347_p4 = scmp.ne.f32.partialorder %s1911_s6, 0.0 }
  0x5d   : > { %v1926_v4 = vld [vmem:[%s1895_s8] sm:$0xff] (%p347_p4)  ;;  %v1929_v5 = vld [vmem:[%s1895_s8 + $0x8] sm:$0xff] (%p347_p4)  ;;  %s351_s16 = sshra.s32 (%p347_p4), %s1145_s23, 7  ;;  %v1935_v9 = vld [vmem:[%s1895_s8 + $0x10] sm:$0xff] (%p347_p4)  ;;  %vm363_vm0 = vcmask (%p347_p4), 261120  }
  0x5e   : > { %350 = sbr.rel (!%p347_p4) target bundleno = 921 (0x399), region = 64  ;;  %413 = vxpose.xlu0.b32.start [1/4] (short) (%p347_p4), %v1926_v4, 128  ;;  %445 = vxpose.xlu1.b32.start [1/4] (short) (%p347_p4), %v1929_v5, 128  ;;  %s1146_s15 = sshll.u32 (%p347_p4), %s351_s16, 3  ;;  %v1938_v10 = vld [vmem:[%s1895_s8 + $0x18] sm:$0xff] (%p347_p4)  ;;  %v359_v12 = vld [vmem:[#allocation3] sm:$0xff] (%p347_p4)  ;;  %v1947_v14 = vld [vmem:[%s1895_s8 + $0x28] sm:$0xff] (%p347_p4) }
  0x5f   : > { %s354_s11 = scalar_lea.vmem (%p347_p4), %s1895_s8, %s1146_s15 [#allocation8]  ;;  %v1944_v13 = vld [vmem:[%s1895_s8 + $0x20] sm:$0xff] (%p347_p4)  ;;  %v360_v15 = vld [vmem:[#allocation3 + $0x8] sm:$0xff] (%p347_p4)  ;;  %v1953_v16 = vld [vmem:[%s1895_s8 + $0x30] sm:$0xff] (%p347_p4) }
  0x60   : > { %v358_v6 = vld [vmem:[%s354_s11 + $0x30] sm:$0xff] (%p347_p4)  ;;  %v357_v7 = vld [vmem:[%s354_s11 + $0x20] sm:$0xff] (%p347_p4)  ;;  %v1956_v17 = vld [vmem:[%s1895_s8 + $0x38] sm:$0xff] (%p347_p4) }
  0x61   : > { %388 = vmatpush.msra.mxu0 (%p347_p4), %v358_v6  ;;  %v356_v8 = vld [vmem:[%s354_s11 + $0x10] sm:$0xff] (%p347_p4)  ;;  %v355_v11 = vld [vmem:[%s354_s11] sm:$0xff] (%p347_p4)  ;;  %v362_v19 = vld [vmem:[#allocation3 + $0x18] sm:$0xff] (%p347_p4) }
  0x62   : > { %v361_v18 = vld [vmem:[#allocation3 + $0x10] sm:$0xff] (%p347_p4) }
  0x63   : > { %389 = vmatpush.msra.mxu0 %v357_v7 }
  0x65   : > { %390 = vmatpush.msra.mxu0 %v356_v8 }
  0x66   : > { %414 = vxpose.xlu0.b32.cont [2/4] (short) %v1935_v9, 128  ;;  %446 = vxpose.xlu1.b32.cont [2/4] (short) %v1938_v10, 128 }
  0x67   : > { %391 = vmatpush.msra.mxu0 %v355_v11 }
  0x68   : > { %1147 = vmatmul.msk.f32.vlgmr.msra.gmra.mxu0 %vm363_vm0, %v359_v12 }
  0x6e   : > { %415 = vxpose.xlu0.b32.cont [3/4] (short) %v1944_v13, 128  ;;  %447 = vxpose.xlu1.b32.cont [3/4] (short) %v1947_v14, 128 }
  0x70   : > { %1148 = vmatmul.msk.f32.gmra.mxu0 %vm363_vm0, %v360_v15 }
  0x76   : > { %416 = vxpose.xlu0.b32.end [4/4] (short) %v1953_v16, 128  ;;  %448 = vxpose.xlu1.b32.end [4/4] (short) %v1956_v17, 128 }
  0x78   : > { %1149 = vmatmul.msk.f32.gmra.mxu0 %vm363_vm0, %v361_v18 }
  0x80   : > { %1150 = vmatmul.msk.f32.gmra.mxu0 %vm363_vm0, %v362_v19 }
  0xe5   : > { %v393_v20 = vpop.f32.mrf.mxu0 }
  0xed   : > { %v396_v21 = vpop.f32.mrf.mxu0 }
  0xf5   : > { %v399_v22 = vpop.f32.mrf.mxu0 }
  0xfd   : > { %v402_v23 = vpop.f32.mrf.mxu0 }
  0xfe   : > { %585 = vmatpush.msrb.mxu0 %v402_v23  ;;  %1193 = vmatpush.msra.mxu1 %v402_v23 }
  0xff   : > { %1194 = vmatpush.msra.mxu2 %v402_v23  ;;  %1195 = vmatpush.msra.mxu3 %v402_v23 }
 0x100   : > { %586 = vmatpush.msrb.mxu0 %v399_v22  ;;  %1196 = vmatpush.msra.mxu1 %v399_v22 }
 0x101   : > { %1197 = vmatpush.msra.mxu2 %v399_v22  ;;  %1198 = vmatpush.msra.mxu3 %v399_v22 }
 0x102   : > { %v429_v24 = vpop.trf.xlu0  ;;  %587 = vmatpush.msrb.mxu0 %v396_v21  ;;  %1199 = vmatpush.msra.mxu1 %v396_v21  ;;  %v461_v25 = vpop.trf.xlu1 }
 0x103   : > { %1200 = vmatpush.msra.mxu2 %v396_v21  ;;  %1201 = vmatpush.msra.mxu3 %v396_v21 }
 0x104   : > { %588 = vmatpush.msrb.mxu0 %v393_v20  ;;  %1202 = vmatpush.msra.mxu1 %v393_v20 }
 0x105   : > { %1203 = vmatpush.msra.mxu2 %v393_v20  ;;  %1204 = vmatpush.msra.mxu3 %v393_v20 }
 0x106   : > { %1151 = vmatmul.msk.f32.vlgmr.msrb.gmra.mxu0 %vm363_vm0, %v429_v24  ;;  %1167 = vmatmul.msk.f32.vlgmr.msra.gmra.mxu2 %vm363_vm0, %v461_v25 }
 0x10a   : > { %v430_v26 = vpop.trf.xlu0  ;;  %v462_v27 = vpop.trf.xlu1 }
 0x10e   : > { %1152 = vmatmul.msk.f32.gmra.mxu0 %vm363_vm0, %v430_v26  ;;  %1168 = vmatmul.msk.f32.gmra.mxu2 %vm363_vm0, %v462_v27 }
 0x112   : > { %v431_v28 = vpop.trf.xlu0  ;;  %v463_v29 = vpop.trf.xlu1 }
 0x116   : > { %1153 = vmatmul.msk.f32.gmra.mxu0 %vm363_vm0, %v431_v28  ;;  %1169 = vmatmul.msk.f32.gmra.mxu2 %vm363_vm0, %v463_v29 }
 0x11a   : > { %v432_v30 = vpop.trf.xlu0  ;;  %v464_v31 = vpop.trf.xlu1 }
 0x11e   : > { %1154 = vmatmul.msk.f32.gmra.mxu0 %vm363_vm0, %v432_v30  ;;  %1170 = vmatmul.msk.f32.gmra.mxu2 %vm363_vm0, %v464_v31 }
 0x122   : > { %v433_v32 = vpop.trf.xlu0  ;;  %v465_v33 = vpop.trf.xlu1 }
 0x123   : > { %1155 = vmatmul.msk.f32.vlgmr.msra.gmra.mxu1 %vm363_vm0, %v433_v32 }
 0x126   : > { %1171 = vmatmul.msk.f32.gmra.mxu2 %vm363_vm0, %v465_v33 }
 0x12a   : > { %v434_v34 = vpop.trf.xlu0  ;;  %v466_v35 = vpop.trf.xlu1 }
 0x12b   : > { %1156 = vmatmul.msk.f32.gmra.mxu1 %vm363_vm0, %v434_v34 }
 0x12e   : > { %1172 = vmatmul.msk.f32.gmra.mxu2 %vm363_vm0, %v466_v35 }
 0x132   : > { %v435_v36 = vpop.trf.xlu0  ;;  %v467_v37 = vpop.trf.xlu1 }
 0x133   : > { %1157 = vmatmul.msk.f32.gmra.mxu1 %vm363_vm0, %v435_v36 }
 0x136   : > { %1173 = vmatmul.msk.f32.gmra.mxu2 %vm363_vm0, %v467_v37 }
 0x13a   : > { %v436_v38 = vpop.trf.xlu0  ;;  %v468_v39 = vpop.trf.xlu1 }
 0x13b   : > { %1158 = vmatmul.msk.f32.gmra.mxu1 %vm363_vm0, %v436_v38 }
 0x13e   : > { %1174 = vmatmul.msk.f32.gmra.mxu2 %vm363_vm0, %v468_v39 }
 0x142   : > { %v437_v40 = vpop.trf.xlu0  ;;  %v469_v41 = vpop.trf.xlu1 }
 0x143   : > { %1159 = vmatmul.msk.f32.gmra.mxu1 %vm363_vm0, %v437_v40  ;;  %1175 = vmatmul.msk.f32.vlgmr.msra.gmra.mxu3 %vm363_vm0, %v469_v41 }
 0x14a   : > { %v438_v42 = vpop.trf.xlu0  ;;  %v470_v43 = vpop.trf.xlu1 }
 0x14b   : > { %1160 = vmatmul.msk.f32.gmra.mxu1 %vm363_vm0, %v438_v42  ;;  %1176 = vmatmul.msk.f32.gmra.mxu3 %vm363_vm0, %v470_v43 }
 0x152   : > { %v439_v44 = vpop.trf.xlu0  ;;  %v471_v45 = vpop.trf.xlu1 }
 0x153   : > { %1161 = vmatmul.msk.f32.gmra.mxu1 %vm363_vm0, %v439_v44  ;;  %1177 = vmatmul.msk.f32.gmra.mxu3 %vm363_vm0, %v471_v45 }
 0x15a   : > { %v440_v46 = vpop.trf.xlu0  ;;  %v472_v47 = vpop.trf.xlu1 }
 0x15b   : > { %1162 = vmatmul.msk.f32.gmra.mxu1 %vm363_vm0, %v440_v46  ;;  %1178 = vmatmul.msk.f32.gmra.mxu3 %vm363_vm0, %v472_v47 }
 0x162   : > { %v441_v48 = vpop.trf.xlu0  ;;  %v473_v49 = vpop.trf.xlu1 }
 0x163   : > { %1163 = vmatmul.msk.f32.gmra.mxu1 %vm363_vm0, %v441_v48  ;;  %1179 = vmatmul.msk.f32.gmra.mxu3 %vm363_vm0, %v473_v49 }
 0x16a   : > { %v442_v50 = vpop.trf.xlu0  ;;  %v474_v51 = vpop.trf.xlu1 }
 0x16b   : > { %1164 = vmatmul.msk.f32.gmra.mxu1 %vm363_vm0, %v442_v50  ;;  %1180 = vmatmul.msk.f32.gmra.mxu3 %vm363_vm0, %v474_v51 }
 0x172   : > { %v443_v52 = vpop.trf.xlu0  ;;  %v475_v53 = vpop.trf.xlu1 }
 0x173   : > { %1165 = vmatmul.msk.f32.gmra.mxu1 %vm363_vm0, %v443_v52  ;;  %1181 = vmatmul.msk.f32.gmra.mxu3 %vm363_vm0, %v475_v53 }
 0x17a   : > { %v444_v54 = vpop.trf.xlu0  ;;  %v476_v55 = vpop.trf.xlu1 }
 0x17b   : > { %1166 = vmatmul.msk.f32.gmra.mxu1 %vm363_vm0, %v444_v54  ;;  %1182 = vmatmul.msk.f32.gmra.mxu3 %vm363_vm0, %v476_v55 }
 0x183   : > { %v590_v7 = vpop.f32.mrf.mxu0 }
 0x189   : > { %v2000_v59 = vpop.f32.mrf.mxu2 }
 0x18b   : > { %v593_v18 = vpop.f32.mrf.mxu0 }
 0x191   : > { %v2004_v61 = vpop.f32.mrf.mxu2 }
 0x193   : > { %v596_v23 = vpop.f32.mrf.mxu0 }
 0x199   : > { %v2012_v1 = vpop.f32.mrf.mxu2 }
 0x19b   : > { %v599_v37 = vpop.f32.mrf.mxu0 }
 0x1a0   : > { %v1994_v56 = vpop.f32.mrf.mxu1 }
 0x1a1   : > { %v2018_v6 = vpop.f32.mrf.mxu2  ;;  %v686_v25 = vmax.f32 %v590_v7, %v1994_v56 }
 0x1a8   : > { %v1996_v57 = vpop.f32.mrf.mxu1 }
 0x1a9   : > { %v2024_v12 = vpop.f32.mrf.mxu2  ;;  %v687_v24 = vmax.f32 %v593_v18, %v1996_v57 }
 0x1b0   : > { %v1998_v58 = vpop.f32.mrf.mxu1 }
 0x1b1   : > { %v2032_v21 = vpop.f32.mrf.mxu2  ;;  %v688_v26 = vmax.f32 %v596_v23, %v1998_v58 }
 0x1b8   : > { %v2002_v60 = vpop.f32.mrf.mxu1 }
 0x1b9   : > { %v2049_v35 = vpop.f32.mrf.mxu2  ;;  %v689_v38 = vmax.f32 %v599_v37, %v2002_v60 }
 0x1c0   : > { %v2006_v62 = vpop.f32.mrf.mxu1 }
 0x1c1   : > { %v690_v29 = vmax.f32 %v686_v25, %v2006_v62  ;;  %v2063_v50 = vpop.f32.mrf.mxu2 }
 0x1c6   : > { %v2008_v63 = vpop.f32.mrf.mxu3 }
 0x1c8   : > { %v2010_v0 = vpop.f32.mrf.mxu1 }
 0x1c9   : > { %v691_v27 = vmax.f32 %v687_v24, %v2010_v0 }
 0x1ce   : > { %v2014_v2 = vpop.f32.mrf.mxu3 }
 0x1d0   : > { %v2016_v3 = vpop.f32.mrf.mxu1 }
 0x1d1   : > { %v692_v30 = vmax.f32 %v688_v26, %v2016_v3 }
 0x1d6   : > { %v2020_v8 = vpop.f32.mrf.mxu3 }
 0x1d8   : > { %v2022_v11 = vpop.f32.mrf.mxu1 }
 0x1d9   : > { %v693_v42 = vmax.f32 %v689_v38, %v2022_v11 }
 0x1de   : > { %v2026_v15 = vpop.f32.mrf.mxu3 }
 0x1e0   : > { %v2028_v19 = vpop.f32.mrf.mxu1 }
 0x1e1   : > { %v694_v33 = vmax.f32 %v690_v29, %v2028_v19 }
 0x1e3   : > { %v698_v39 = vmax.f32 %v694_v33, %v2000_v59 }
 0x1e5   : > { %v702_v45 = vmax.f32 %v698_v39, %v2024_v12 }
 0x1e6   : > { %v2030_v20 = vpop.f32.mrf.mxu3 }
 0x1e7   : > { %v706_v51 = vmax.f32 %v702_v45, %v2008_v63 }
 0x1e8   : > { %v2034_v22 = vpop.f32.mrf.mxu1 }
 0x1e9   : > { %v695_v31 = vmax.f32 %v691_v27, %v2034_v22  ;;  %v710_v25 = vmax.f32 %v706_v51, %v2030_v20 }
 0x1eb   : > { %v699_v36 = vmax.f32 %v695_v31, %v2004_v61 }
 0x1ed   : > { %v703_v43 = vmax.f32 %v699_v36, %v2032_v21 }
 0x1ee   : > { %v2040_v28 = vpop.f32.mrf.mxu3 }
 0x1ef   : > { %v707_v48 = vmax.f32 %v703_v43, %v2014_v2 }
 0x1f0   : > { %v2045_v32 = vpop.f32.mrf.mxu1 }
 0x1f1   : > { %v696_v34 = vmax.f32 %v692_v30, %v2045_v32  ;;  %v711_v55 = vmax.f32 %v707_v48, %v2040_v28 }
 0x1f3   : > { %v700_v40 = vmax.f32 %v696_v34, %v2012_v1  ;;  %v714_v29 = vmax.f32 %v710_v25, %v711_v55 }
 0x1f5   : > { %v704_v47 = vmax.f32 %v700_v40, %v2049_v35 }
 0x1f6   : > { %v2055_v41 = vpop.f32.mrf.mxu3 }
 0x1f7   : > { %v708_v53 = vmax.f32 %v704_v47, %v2020_v8 }
 0x1f8   : > { %v635_v44 = vpop.f32.mrf.mxu1 }
 0x1f9   : > { %v697_v46 = vmax.f32 %v693_v42, %v635_v44  ;;  %v712_v26 = vmax.f32 %v708_v53, %v2055_v41 }
 0x1fb   : > { %v701_v49 = vmax.f32 %v697_v46, %v2018_v6 }
 0x1fd   : > { %v705_v52 = vmax.f32 %v701_v49, %v2063_v50 }
 0x1fe   : > { %v2068_v54 = vpop.f32.mrf.mxu3 }
 0x1ff   : > { %v709_v24 = vmax.f32 %v705_v52, %v2026_v15 }
 0x201   : > { %v713_v27 = vmax.f32 %v709_v24, %v2068_v54 }
 0x203   : > { %v715_v30 = vmax.f32 %v712_v26, %v713_v27 }
 0x205   : > { %v716_v31 = vmax.f32 %v714_v29, %v715_v30 }
 0x207   : > { %v717_v33 = vrot.slane %v716_v31, 4 }
 0x209   : > { %v718_v34 = vmax.f32 %v716_v31, %v717_v33 }
 0x20b   : > { %v719_v36 = vrot.slane %v718_v34, 2 }
 0x20d   : > { %v720_v38 = vmax.f32 %v718_v34, %v719_v36 }
 0x20f   : > { %v721_v39 = vrot.slane %v720_v38, 1 }
 0x211   : > { %v2075_v40 = vmax.f32 %v720_v38, %v721_v39 }
 0x213   : > { %v723_v42 = vsub.f32 %v590_v7, %v2075_v40  ;;  %v724_v43 = vsub.f32 %v593_v18, %v2075_v40  ;;  %v725_v45 = vsub.f32 %v596_v23, %v2075_v40  ;;  %v726_v46 = vsub.f32 %v599_v37, %v2075_v40 }
 0x214   : > { %v727_v49 = vsub.f32 %v1994_v56, %v2075_v40  ;;  %v728_v52 = vsub.f32 %v1996_v57, %v2075_v40  ;;  %v729_v7 = vsub.f32 %v1998_v58, %v2075_v40  ;;  %v730_v23 = vsub.f32 %v2002_v60, %v2075_v40 }
 0x215   : > { %v755_v47 = vmul.f32 1.442695, %v723_v42  ;;  %v757_v48 = vmul.f32 1.442695, %v724_v43  ;;  %v759_v51 = vmul.f32 1.442695, %v725_v45  ;;  %v731_v56 = vsub.f32 %v2006_v62, %v2075_v40 }
 0x216   : > { %v761_v53 = vmul.f32 1.442695, %v726_v46  ;;  %v763_v18 = vmul.f32 1.442695, %v727_v49  ;;  %v765_v37 = vmul.f32 1.442695, %v728_v52  ;;  %v738_v57 = vsub.f32 %v635_v44, %v2075_v40 }
 0x217   : > { %1341 = vpow2.f32 %v755_v47  ;;  %v767_v25 = vmul.f32 1.442695, %v729_v7  ;;  %v732_v58 = vsub.f32 %v2010_v0, %v2075_v40  ;;  %v737_v27 = vsub.f32 %v2045_v32, %v2075_v40 }
 0x218   : > { %1343 = vpow2.f32 %v757_v48  ;;  %v769_v29 = vmul.f32 1.442695, %v730_v23  ;;  %v733_v62 = vsub.f32 %v2016_v3, %v2075_v40  ;;  %v771_v30 = vmul.f32 1.442695, %v731_v56 }
 0x219   : > { %1345 = vpow2.f32 %v759_v51  ;;  %v736_v0 = vsub.f32 %v2034_v22, %v2075_v40  ;;  %v785_v33 = vmul.f32 1.442695, %v738_v57  ;;  %v734_v34 = vsub.f32 %v2022_v11, %v2075_v40 }
 0x21a   : > { %1347 = vpow2.f32 %v761_v53  ;;  %v773_v36 = vmul.f32 1.442695, %v732_v58  ;;  %v735_v3 = vsub.f32 %v2028_v19, %v2075_v40  ;;  %v783_v39 = vmul.f32 1.442695, %v737_v27 }
 0x21b   : > { %1349 = vpow2.f32 %v763_v18  ;;  %v775_v42 = vmul.f32 1.442695, %v733_v62  ;;  %v781_v45 = vmul.f32 1.442695, %v736_v0  ;;  %v777_v11 = vmul.f32 1.442695, %v734_v34 }
 0x21c   : > { %1351 = vpow2.f32 %v765_v37  ;;  %v779_v48 = vmul.f32 1.442695, %v735_v3  ;;  %v739_v18 = vsub.f32 %v2000_v59, %v2075_v40  ;;  %v754_v56 = vsub.f32 %v2068_v54, %v2075_v40 }
 0x21d   : > { %v2089_v55 = vpop.eup %1341  ;;  %1353 = vpow2.f32 %v767_v25  ;;  %v740_v25 = vsub.f32 %v2004_v61, %v2075_v40  ;;  %v753_v27 = vsub.f32 %v2055_v41, %v2075_v40  ;;  %v741_v59 = vsub.f32 %v2012_v1, %v2075_v40 }
 0x21e   : > { %v2093_v24 = vpop.eup %1343  ;;  %1355 = vpow2.f32 %v769_v29  ;;  %v787_v62 = vmul.f32 1.442695, %v739_v18  ;;  %v752_v54 = vsub.f32 %v2040_v28, %v2075_v40  ;;  %v817_v0 = vmul.f32 1.442695, %v754_v56 }
 0x21f   : > { %v819_v26 = vadd.f32 %v2093_v24, %v2089_v55  ;;  %v2100_v60 = vpop.eup %1345  ;;  %1357 = vpow2.f32 %v771_v30  ;;  %v742_v61 = vsub.f32 %v2018_v6, %v2075_v40  ;;  %v751_v41 = vsub.f32 %v2030_v20, %v2075_v40 }
 0x220   : > { %v2107_v31 = vpop.eup %1347  ;;  %1359 = vpow2.f32 %v785_v33  ;;  %v789_v33 = vmul.f32 1.442695, %v740_v25  ;;  %v743_v1 = vsub.f32 %v2024_v12, %v2075_v40  ;;  %v750_v28 = vsub.f32 %v2026_v15, %v2075_v40 }
 0x221   : > { %v820_v44 = vadd.f32 %v2100_v60, %v819_v26  ;;  %v2114_v38 = vpop.eup %1349  ;;  %1361 = vpow2.f32 %v773_v36  ;;  %v815_v36 = vmul.f32 1.442695, %v753_v27  ;;  %v744_v6 = vsub.f32 %v2032_v21, %v2075_v40 }
 0x222   : > { %v2119_v22 = vpop.eup %1351  ;;  %1363 = vpow2.f32 %v783_v39  ;;  %v813_v39 = vmul.f32 1.442695, %v752_v54  ;;  %v749_v20 = vsub.f32 %v2020_v8, %v2075_v40  ;;  %v811_v12 = vmul.f32 1.442695, %v751_v41 }
 0x223   : > { %v821_v32 = vadd.f32 %v2107_v31, %v820_v44  ;;  %v2122_v47 = vpop.eup %1353  ;;  %1365 = vpow2.f32 %v775_v42  ;;  %v793_v42 = vmul.f32 1.442695, %v742_v61  ;;  %v809_v21 = vmul.f32 1.442695, %v750_v28 }
 0x224   : > { %v2125_v49 = vpop.eup %1355  ;;  %1367 = vpow2.f32 %v781_v45  ;;  %v745_v45 = vsub.f32 %v2049_v35, %v2075_v40  ;;  %v797_v8 = vmul.f32 1.442695, %v744_v6  ;;  %v747_v35 = vsub.f32 %v2008_v63, %v2075_v40 }
 0x225   : > { %v822_v43 = vadd.f32 %v2114_v38, %v821_v32  ;;  %v1358_v51 = vpop.eup %1357  ;;  %1369 = vpow2.f32 %v777_v11  ;;  %v791_v32 = vmul.f32 1.442695, %v741_v59  ;;  %v795_v11 = vmul.f32 1.442695, %v743_v1 }
 0x226   : > { %v1360_v53 = vpop.eup %1359  ;;  %1371 = vpow2.f32 %v779_v48 }
 0x227   : > { %v823_v46 = vadd.f32 %v2119_v22, %v822_v43  ;;  %v1362_v7 = vpop.eup %1361  ;;  %856 = vmatpush.msrb.mxu2 %v1360_v53  ;;  %1373 = vpow2.f32 %v787_v62 }
 0x228   : > { %v1364_v37 = vpop.eup %1363  ;;  %1375 = vpow2.f32 %v817_v0 }
 0x229   : > { %v824_v19 = vadd.f32 %v2122_v47, %v823_v46  ;;  %v1366_v57 = vpop.eup %1365  ;;  %857 = vmatpush.msrb.mxu2 %v1364_v37  ;;  %1377 = vpow2.f32 %v789_v33  ;;  %v748_v46 = vsub.f32 %v2014_v2, %v2075_v40  ;;  %v799_v2 = vmul.f32 1.442695, %v745_v45 }
 0x22a   : > { %v1368_v26 = vpop.eup %1367  ;;  %1379 = vpow2.f32 %v815_v36 }
 0x22b   : > { %v825_v52 = vadd.f32 %v2125_v49, %v824_v19  ;;  %v1370_v29 = vpop.eup %1369  ;;  %858 = vmatpush.msrb.mxu2 %v1368_v26  ;;  %1381 = vpow2.f32 %v791_v32  ;;  %v746_v19 = vsub.f32 %v2063_v50, %v2075_v40 }
 0x22c   : > { %v1372_v44 = vpop.eup %1371  ;;  %1383 = vpow2.f32 %v813_v39 }
 0x22d   : > { %v826_v23 = vadd.f32 %v1358_v51, %v825_v52  ;;  %859 = vmatpush.msrb.mxu2 %v1372_v44  ;;  %v2156_v48 = vpop.eup %1373  ;;  %1385 = vpow2.f32 %v793_v42  ;;  %v801_v56 = vmul.f32 1.442695, %v746_v19  ;;  %v920_v19 = vld [vmem:[#allocation6 + $0x8] sm:$0xff] }
 0x22e   : > { %v2160_v18 = vpop.eup %1375  ;;  %1387 = vpow2.f32 %v811_v12 }
 0x22f   : > { %v827_v58 = vadd.f32 %v1362_v7, %v826_v23  ;;  %860 = vmatpush.msrb.mxu2 %v1370_v29  ;;  %v2164_v23 = vpop.eup %1377  ;;  %1389 = vpow2.f32 %v795_v11  ;;  %885 = vmatpush.msrb.mxu3 %v2160_v18 }
 0x230   : > { %v1380_v50 = vpop.eup %1379  ;;  %1391 = vpow2.f32 %v809_v21 }
 0x231   : > { %v828_v30 = vadd.f32 %v1366_v57, %v827_v58  ;;  %861 = vmatpush.msrb.mxu2 %v1366_v57  ;;  %1393 = vpow2.f32 %v797_v8  ;;  %886 = vmatpush.msrb.mxu3 %v1380_v50  ;;  %v803_v57 = vmul.f32 1.442695, %v747_v35  ;;  %v921_v8 = vld [vmem:[#allocation6 + $0x10] sm:$0xff] }
 0x233   : > { %v829_v34 = vadd.f32 %v1370_v29, %v828_v30  ;;  %862 = vmatpush.msrb.mxu2 %v1362_v7  ;;  %v807_v7 = vmul.f32 1.442695, %v749_v20 }
 0x235   : > { %v830_v3 = vadd.f32 %v1372_v44, %v829_v34  ;;  %863 = vmatpush.msrb.mxu2 %v1358_v51  ;;  %v1382_v51 = vpop.eup %1381  ;;  %1395 = vpow2.f32 %v807_v7  ;;  %v969_v7 = vld [vmem:[%s1904_s20] sm:$0xff] }
 0x236   : > { %v1384_v40 = vpop.eup %1383  ;;  %1397 = vpow2.f32 %v799_v2 }
 0x237   : > { %v831_v43 = vadd.f32 %v1368_v26, %v830_v3  ;;  %864 = vmatpush.msrb.mxu2 %v2125_v49  ;;  %v1386_v25 = vpop.eup %1385  ;;  %887 = vmatpush.msrb.mxu3 %v1384_v40 }
 0x238   : > { %v1388_v49 = vpop.eup %1387 }
 0x239   : > { %v832_v15 = vadd.f32 %v1364_v37, %v831_v43  ;;  %865 = vmatpush.msrb.mxu2 %v2122_v47  ;;  %v1390_v26 = vpop.eup %1389  ;;  %888 = vmatpush.msrb.mxu3 %v1388_v49 }
 0x23a   : > { %v1392_v29 = vpop.eup %1391 }
 0x23b   : > { %v833_v52 = vadd.f32 %v1360_v53, %v832_v15  ;;  %v805_v53 = vmul.f32 1.442695, %v748_v46  ;;  %866 = vmatpush.msrb.mxu2 %v2119_v22  ;;  %v1394_v47 = vpop.eup %1393  ;;  %889 = vmatpush.msrb.mxu3 %v1392_v29 }
 0x23c   : > { %v1396_v62 = vpop.eup %1395 }
 0x23d   : > { %v834_v37 = vadd.f32 %v2156_v48, %v833_v52  ;;  %1399 = vpow2.f32 %v805_v53  ;;  %867 = vmatpush.msrb.mxu2 %v2114_v38  ;;  %v1398_v30 = vpop.eup %1397  ;;  %890 = vmatpush.msrb.mxu3 %v1396_v62  ;;  %v922_v52 = vld [vmem:[#allocation6 + $0x18] sm:$0xff] }
 0x23e   : > { %1401 = vpow2.f32 %v801_v56 }
 0x23f   : > { %v835_v63 = vadd.f32 %v2164_v23, %v834_v37  ;;  %1403 = vpow2.f32 %v803_v57  ;;  %868 = vmatpush.msrb.mxu2 %v2107_v31 }
 0x241   : > { %v836_v58 = vadd.f32 %v1382_v51, %v835_v63  ;;  %869 = vmatpush.msrb.mxu2 %v2100_v60  ;;  %v971_v63 = vld [vmem:[%s1904_s20 + $0x10] sm:$0xff] }
 0x243   : > { %v837_v27 = vadd.f32 %v1386_v25, %v836_v58  ;;  %v1400_v22 = vpop.eup %1399  ;;  %870 = vmatpush.msrb.mxu2 %v2093_v24  ;;  %v972_v58 = vld [vmem:[%s1904_s20 + $0x18] sm:$0xff] }
 0x244   : > { %v1402_v54 = vpop.eup %1401  ;;  %891 = vmatpush.msrb.mxu3 %v1400_v22 }
 0x245   : > { %v838_v59 = vadd.f32 %v1390_v26, %v837_v27  ;;  %v1404_v38 = vpop.eup %1403  ;;  %871 = vmatpush.msrb.mxu2 %v2089_v55 }
 0x246   : > { %892 = vmatpush.msrb.mxu3 %v1404_v38  ;;  %872 = vmatmul.f32.vlgmr.msrb.gmra.mxu2 %v1926_v4 }
 0x247   : > { %v839_v44 = vadd.f32 %v1394_v47, %v838_v59 }
 0x248   : > { %893 = vmatpush.msrb.mxu3 %v1402_v54 }
 0x249   : > { %v840_v0 = vadd.f32 %v1398_v30, %v839_v44 }
 0x24a   : > { %894 = vmatpush.msrb.mxu3 %v1398_v30 }
 0x24b   : > { %v841_v61 = vadd.f32 %v1402_v54, %v840_v0 }
 0x24c   : > { %895 = vmatpush.msrb.mxu3 %v1394_v47 }
 0x24d   : > { %v842_v31 = vadd.f32 %v1404_v38, %v841_v61 }
 0x24e   : > { %896 = vmatpush.msrb.mxu3 %v1390_v26  ;;  %875 = vmatmul.f32.gmra.mxu2 %v1935_v9 }
 0x24f   : > { %v843_v33 = vadd.f32 %v1400_v22, %v842_v31 }
 0x250   : > { %897 = vmatpush.msrb.mxu3 %v1386_v25 }
 0x251   : > { %v844_v34 = vadd.f32 %v1396_v62, %v843_v33 }
 0x252   : > { %898 = vmatpush.msrb.mxu3 %v1382_v51 }
 0x253   : > { %v845_v60 = vadd.f32 %v1392_v29, %v844_v34 }
 0x254   : > { %899 = vmatpush.msrb.mxu3 %v2164_v23 }
 0x255   : > { %v846_v41 = vadd.f32 %v1388_v49, %v845_v60 }
 0x256   : > { %900 = vmatpush.msrb.mxu3 %v2156_v48  ;;  %878 = vmatmul.f32.gmra.mxu2 %v1944_v13  ;;  %v919_v48 = vld [vmem:[#allocation6] sm:$0xff] }
 0x257   : > { %v847_v24 = vadd.f32 %v1384_v40, %v846_v41  ;;  %901 = vmatmul.f32.vlgmr.msrb.gmra.mxu3 %v1929_v5 }
 0x259   : > { %v848_v36 = vadd.f32 %v1380_v50, %v847_v24  ;;  %v970_v50 = vld [vmem:[%s1904_s20 + $0x8] sm:$0xff] }
 0x25b   : > { %v849_v55 = vadd.f32 %v2160_v18, %v848_v36  ;;  %v964_v18 = vstv %s1911_s6 }
 0x25d   : > { %v850_v9 = vrot.slane %v849_v55, 4 }
 0x25e   : > { %881 = vmatmul.f32.gmra.mxu2 %v1953_v16 }
 0x25f   : > { %904 = vmatmul.f32.gmra.mxu3 %v1938_v10  ;;  %v851_v1 = vadd.f32 %v850_v9, %v849_v55 }
 0x261   : > { %v852_v28 = vrot.slane %v851_v1, 2 }
 0x263   : > { %v853_v39 = vadd.f32 %v852_v28, %v851_v1 }
 0x265   : > { %v854_v42 = vrot.slane %v853_v39, 1 }
 0x267   : > { %907 = vmatmul.f32.gmra.mxu3 %v1947_v14  ;;  %v855_v43 = vadd.f32 %v854_v42, %v853_v39 }
 0x269   : > { %1405 = vrcp.f32 %v855_v43 }
 0x26f   : > { %910 = vmatmul.f32.gmra.mxu3 %v1956_v17  ;;  %v1406_v14 = vpop.eup %1405 }
 0x2c9   : > { %v873_v4 = vpop.f32.mrf.mxu2 }
 0x2d1   : > { %v876_v3 = vpop.f32.mrf.mxu2 }
 0x2d9   : > { %v879_v5 = vpop.f32.mrf.mxu2 }
 0x2da   : > { %v902_v32 = vpop.f32.mrf.mxu3 }
 0x2db   : > { %v903_v11 = vadd.f32 %v902_v32, %v873_v4 }
 0x2dd   : > { %v915_v21 = vmul.f32 %v1406_v14, %v903_v11 }
 0x2e1   : > { %v882_v10 = vpop.f32.mrf.mxu2 }
 0x2e2   : > { %v905_v6 = vpop.f32.mrf.mxu3 }
 0x2e3   : > { %v906_v45 = vadd.f32 %v905_v6, %v876_v3 }
 0x2e5   : > { %v916_v46 = vmul.f32 %v1406_v14, %v906_v45 }
 0x2ea   : > { %v908_v13 = vpop.f32.mrf.mxu3 }
 0x2eb   : > { %v909_v16 = vadd.f32 %v908_v13, %v879_v5 }
 0x2ed   : > { %v917_v15 = vmul.f32 %v1406_v14, %v909_v16 }
 0x2f2   : > { %v911_v20 = vpop.f32.mrf.mxu3 }
 0x2f3   : > { %v912_v12 = vadd.f32 %v911_v20, %v882_v10 }
 0x2f5   : > { %v918_v17 = vmul.f32 %v1406_v14, %v912_v12 }
 0x2f7   : > { %947 = vmatpush.msra.mxu0 %v918_v17 }
 0x2f9   : > { %948 = vmatpush.msra.mxu0 %v917_v15 }
 0x2fb   : > { %949 = vmatpush.msra.mxu0 %v916_v46 }
 0x2fd   : > { %950 = vmatpush.msra.mxu0 %v915_v21 }
 0x2fe   : > { %1183 = vmatmul.msk.f32.vlgmr.msra.gmra.mxu0 %vm363_vm0, %v919_v48 }
 0x306   : > { %1184 = vmatmul.msk.f32.gmra.mxu0 %vm363_vm0, %v920_v19 }
 0x30e   : > { %1185 = vmatmul.msk.f32.gmra.mxu0 %vm363_vm0, %v921_v8 }
 0x316   : > { %1186 = vmatmul.msk.f32.gmra.mxu0 %vm363_vm0, %v922_v52 }
 0x37b   : > { %v952_v35 = vpop.f32.mrf.mxu0 }
 0x37c   : > { %v965_v23 = vmul.f32 %v964_v18, %v952_v35 }
 0x37e   : > { %v973_v2 = vadd.f32 %v969_v7, %v965_v23 }
 0x380   : > { %977 = vst [vmem:[%s1914_s7] sm:$0xff] %v973_v2 }
 0x383   : > { %v955_v37 = vpop.f32.mrf.mxu0 }
 0x384   : > { %v966_v53 = vmul.f32 %v964_v18, %v955_v37 }
 0x386   : > { %v974_v51 = vadd.f32 %v970_v50, %v966_v53 }
 0x388   : > { %978 = vst [vmem:[%s1914_s7 + $0x8] sm:$0xff] %v974_v51 }
 0x38b   : > { %v958_v56 = vpop.f32.mrf.mxu0 }
 0x38c   : > { %v967_v40 = vmul.f32 %v964_v18, %v958_v56 }
 0x38e   : > { %v975_v57 = vadd.f32 %v971_v63, %v967_v40 }
 0x390   : > { %979 = vst [vmem:[%s1914_s7 + $0x10] sm:$0xff] %v975_v57 }
 0x393   : > { %v961_v25 = vpop.f32.mrf.mxu0 }
 0x394   : > { %v968_v49 = vmul.f32 %v964_v18, %v961_v25 }
 0x396   : > { %v976_v26 = vadd.f32 %v972_v58, %v968_v49 }
 0x398   : > { %980 = vst [vmem:[%s1914_s7 + $0x18] sm:$0xff] %v976_v26 }
 0x399 PF: > { %s2301_s14 = sld [smem:[#allocation18_spill]]  ;;  %s995_s3 = sshll.u32 %s1914_s7, 4  ;;  %s996_s3 = int_to_ptr.vmem [resolvable:$true] %s995_s3 }
 0x39a   : > { %s2302_s9 = sld [smem:[#allocation17_spill]]  ;;  %s982_s20 = scalar_lea.sflag [#allocation5], %s298_s18 }
 0x39b   : > { %s2304_s13 = sld [smem:[#allocation26_spill]] }
 0x39f   : > { %s1188_s17 = sshll.u32 %s2301_s14, 3 }
 0x3a0   : > { %s992_s2 = sadd.s32 %s2302_s9, %s1188_s17 }
 0x3a1   : > { %s1189_s26 = sshll.u32 %s992_s2, 3  ;;  %s1547_s7 = scalar_lea.hbm %s2304_s13, 128 }
 0x3a2   : > { %s994_s1 = scalar_lea.hbm %s2304_s13, %s1189_s26 }
 0x3a3   : > { %s997_s30 = sshll.u32 %s994_s1, 4  ;;  %s998_s30 = int_to_ptr.hbm [resolvable:$true] %s997_s30 }
 0x3a4   : > { %s1541_s23 = sshra.s32 %s998_s30, 4  ;;  %s1542_s23 = int_to_ptr.hbm [resolvable:$true] %s1541_s23 }
 0x3a5   : > { %s1543_s6 = scalar_lea.hbm %s1542_s23, 32  ;;  %p1548_p9 = scmp.lt.s32.totalorder %s1542_s23, %s2304_s13 }
 0x3a6   : > { %p1544_p6 = scmp.ne.s32.totalorder %s1542_s23, %s1543_s6  ;;  %p1549_p11 = scmp.lt.s32.totalorder %s1547_s7, %s1543_s6 }
 0x3a8   : > { %p1545_p10 = pnand %p1544_p6, %p1854_p5  ;;  %p1550_p13 = por %p1549_p11, %p1548_p9 }
 0x3aa   : > { %p1546_p2 = pneg %p1545_p10 }
 0x3ac   : > { %p1551_p12 = pnand %p1550_p13, %p1546_p2 }
 0x3ae   : > { %1554 = shalt.err (!%p1551_p12)
}
 0x3af   : > { %s1669_s18 = smov 128   ;;  %s1670_s9 = smov 256  }
 0x3b0   : > { %s1671_s17 = smov 8  }
 0x3b1   : > { %1217 = dma.vmem_to_hbm [thread:$0]  (%p1854_p5), %s996_s3, 512, %s998_s30, %s982_s20, %s1669_s18, %s1670_s9, %s1671_s17  }
 0x3b2 PF: > { %s2305_s2 = sld [smem:[#allocation16_spill]]  ;;  %p1242_p0 = scmp.ge.s32.totalorder %s1661_s29, 2 }
 0x3b4   : > { %p1234_p7 = pnand %p1242_p0, %p1780_p8 }
 0x3b6   : > { %p1235_p3 = pneg %p1234_p7 }
 0x3b8   : > { %s1012_s27 = sand.u32 1, %s2305_s2  }
 0x3b9   : > { %s1013_s8 = scalar_lea.sflag [#allocation5], %s1012_s27 }
 0x3ba   : > { %1616 = dma.done.wait (%p1235_p3), %s1013_s8, 512  }
 0x3bb   : > { %1618 = vsyncadd (%p1235_p3), %s1013_s8, 4294966784  ;;  %s21_s29 = sadd.s32 1, %s1661_s29   ;;  %s2307_s5 = sld [smem:[#allocation21_spill]] }
 0x3bc   : > { %p18_p1 = scmp.ge.s32.totalorder %s21_s29, 6   ;;  %s2308_s20 = smov %s1625_s21 }
 0x3bd   : > { %s2309_s21 = smov %s1629_s22  ;;  %s2310_s22 = smov %s1873_s12 }
 0x3be   : > { %s2311_s23 = smov %s1637_s24  ;;  %s2312_s24 = smov %s1641_s25 }
 0x3bf   : > { %s2313_s25 = smov %s1870_s19  ;;  %s2314_s26 = smov %s1653_s0 }
 0x3c0   : > { %s2315_s27 = smov %s1657_s28  ;;  %s2317_s28 = smov %s2323_s10 }
 0x3c1   : > { %s2316_s0 = smov %s2307_s5  ;;  %20 = sbr.rel (!%p18_p1) target bundleno = 15 (0xf), region = 112 }
 0x3c6   :  { %1019 = vsyncpa [#allocation4], 1 }
 0x3c7   :  { %1021 = vsyncpa [#allocation4 + $0x1], 1 }
 0x3c8   :  { %1022 = vsyncpa [#allocation7], 1 }
 0x3c9   :  { %1023 = vsyncpa [#allocation5], 1 }
 0x3ca   :  { %1025 = vsyncpa [#allocation5 + $0x1], 1 }

</bundles_post_ra>
